<compile_context>
chip_gen: v7x
topology: tpu7x:2x2x1
jax: 0.10.0
libtpu: 0.0.40
codegen_flags: <defaults>
</compile_context>

<pallas_src>
import functools

import jax
import jax.numpy as jnp
from jax.experimental import pallas as pl
from jax.experimental.pallas import tpu as pltpu


# --------------------------------------------------------------------------- #
# Kernel
# --------------------------------------------------------------------------- #
def _head_kernel(x_ref, pos_ref, wk_ref, wq_ref, wv_ref, out_ref, *rest,
                 head_size, q_block, compute_dtype):
    # rest = ([wei_ref,] k_scratch, v_scratch)
    if len(rest) == 3:
        wei_ref, k_sc, v_sc = rest
    else:
        wei_ref = None
        k_sc, v_sc = rest

    blk_b, T, C = x_ref.shape
    H = head_size
    Tq = q_block
    qi = pl.program_id(1)

    # ---- K / V projection: once per batch block, cached in VMEM scratch ----
    @pl.when(qi == 0)
    def _():
        x = x_ref[...]                                   # (Bt, T, C)
        xp = x + pos_ref[...][None]                      # x + pos for K (and Q)
        k = jnp.dot(xp.reshape(blk_b * T, C), wk_ref[...],
                    preferred_element_type=jnp.float32)  # (Bt*T, H) f32 acc
        v = jnp.dot(x.reshape(blk_b * T, C), wv_ref[...],
                    preferred_element_type=jnp.float32)
        k_sc[...] = k.reshape(blk_b, T, H).astype(k_sc.dtype)
        v_sc[...] = v.reshape(blk_b, T, H).astype(v_sc.dtype)

    # ---- Q projection for this query tile only ------------------------------
    qs = pl.multiple_of(qi * Tq, Tq)
    xq = x_ref[:, pl.ds(qs, Tq), :] + pos_ref[pl.ds(qs, Tq), :][None]
    q = jnp.dot(xq.reshape(blk_b * Tq, C), wq_ref[...],
                preferred_element_type=jnp.float32)
    q = q.reshape(blk_b, Tq, H).astype(compute_dtype)

    # ---- scores: contract on the head dim (no explicit K transpose) --------
    scale = float(H) ** -0.5
    scores = jax.lax.dot_general(
        q, k_sc[...],
        dimension_numbers=(((2,), (2,)), ((0,), (0,))),
        preferred_element_type=jnp.float32) * scale      # (Bt, Tq, T) f32

    # ---- causal mask (built once per step, shared across the batch block) --
    row = qs + jax.lax.broadcasted_iota(jnp.int32, (Tq, T), 0)
    col = jax.lax.broadcasted_iota(jnp.int32, (Tq, T), 1)
    neg_big = jnp.float32(-1e30)   # finite "-inf": exp underflows to 0, no NaN
    scores = jnp.where((row >= col)[None, :, :], scores, neg_big)

    # ---- numerically stable f32 softmax; EUP reciprocal (approx) -----------
    m = jnp.max(scores, axis=-1, keepdims=True)
    e = jnp.exp(scores - m)
    s = jnp.sum(e, axis=-1, keepdims=True)
    p = e * pl.reciprocal(s, approx=True)

    out = jax.lax.dot_general(
        p.astype(compute_dtype), v_sc[...],
        dimension_numbers=(((2,), (1,)), ((0,), (0,))),
        preferred_element_type=jnp.float32)              # (Bt, Tq, H)

    out_ref[...] = out.astype(out_ref.dtype)
    if wei_ref is not None:
        wei_ref[...] = p.astype(wei_ref.dtype)


# --------------------------------------------------------------------------- #
# Generation-aware sizing helpers
# --------------------------------------------------------------------------- #
def _device_vmem_and_cores():
    """Return (vmem_limit_bytes, tensorcores_per_chip) for the local TPU gen."""
    kind = ""
    try:
        kind = jax.devices()[0].device_kind.lower()
    except Exception:
        pass
    if "v7" in kind:
        return 48 * 1024 * 1024, 2          # 64 MiB physical per TC; headroom
    if "v6" in kind or "v5 lite" in kind or "v5e" in kind or "v5lite" in kind:
        return 96 * 1024 * 1024, 1          # 128 MiB physical
    return 64 * 1024 * 1024, 1              # conservative default (v4/unknown)


def _choose_q_block(T, max_tq=256):
    """Largest divisor of T that is a multiple of 8 and <= max_tq (else T)."""
    if T <= max_tq:
        return T
    for tq in range(max_tq, 7, -1):
        if T % tq == 0 and tq % 8 == 0:
            return tq
    return T


def _vmem_bytes_per_batch(T, C, H, Tq, compute_dtype, out_dtype, wei_dtype,
                          return_wei):
    """Rough per-unit-of-block_b VMEM footprint of one grid step."""
    cb = jnp.dtype(compute_dtype).itemsize
    ob = jnp.dtype(out_dtype).itemsize
    b = 2 * T * C * cb                       # x block (double-buffered)
    b += 2 * Tq * H * ob                     # out block (double-buffered)
    b += 2 * (T * H * cb)                    # k + v scratch
    b += 4 * Tq * T * 4                      # scores / exp / p f32 slabs
    b += 2 * T * H * 4                       # projection f32 intermediates
    if return_wei:
        b += 2 * Tq * T * jnp.dtype(wei_dtype).itemsize
    return b


def _choose_block_b(B, per_batch_bytes, budget_bytes, cores):
    divisors = [d for d in range(1, B + 1) if B % d == 0]
    fitting = [d for d in divisors if d * per_batch_bytes <= budget_bytes] or [1]
    if cores > 1:
        balanced = [d for d in fitting if (B // d) % cores == 0]
        if balanced:
            return max(balanced)             # even split across TensorCores
    return max(fitting)                      # single core: fill the budget


# --------------------------------------------------------------------------- #
# Wrapper
# --------------------------------------------------------------------------- #
def head_forward(x, pos_emb, wk, wq, wv, *, block_b=None, q_block=None,
                 return_wei=True, compute_dtype=jnp.bfloat16, wei_dtype=None):
    """x: (B, T, C), pos_emb: (T, C), wk/wq/wv: (C, H) (pre-transposed Linear).

    Returns (out, wei) if return_wei else out.  `compute_dtype` sets the MXU
    input dtype (default bf16; pass jnp.float32 for exact PyTorch numerics);
    accumulation and softmax are always f32.  `wei_dtype` (default: x.dtype)
    can be set to bf16 to halve the (B, T, T) writeback traffic.
    """
    B, T, C = x.shape
    assert pos_emb.shape == (T, C), "pos_emb shape mismatch"
    assert wk.shape == wq.shape == wv.shape and wk.shape[0] == C, \
        "wk/wq/wv must all be (C, H)"
    H = wk.shape[1]
    out_dtype = x.dtype
    if wei_dtype is None:
        wei_dtype = out_dtype

    vmem_limit, cores = _device_vmem_and_cores()

    # ---- query tiling (bounds the T x T working set) ------------------------
    if q_block is None:
        q_block = _choose_q_block(T)
    assert T % q_block == 0 and (q_block % 8 == 0 or q_block == T), \
        "q_block must divide T and be a multiple of 8 (or equal T)"
    n_q = T // q_block

    # ---- batch blocking: divisor of B (no pad concat), VMEM-budget aware ----
    per_b = _vmem_bytes_per_batch(T, C, H, q_block, compute_dtype, out_dtype,
                                  wei_dtype, return_wei)
    if block_b is None:
        block_b = _choose_block_b(B, per_b, int(0.4 * vmem_limit), cores)
    if B % block_b != 0:
        raise ValueError(f"block_b={block_b} must divide B={B}")
    n_b = B // block_b

    xk = x.astype(compute_dtype)
    pos = pos_emb.astype(compute_dtype)
    wk_c = wk.astype(compute_dtype)
    wq_c = wq.astype(compute_dtype)
    wv_c = wv.astype(compute_dtype)

    kernel = functools.partial(_head_kernel, head_size=H, q_block=q_block,
                               compute_dtype=compute_dtype)

    out_shapes = [jax.ShapeDtypeStruct((B, T, H), out_dtype)]
    out_specs = [pl.BlockSpec((block_b, q_block, H), lambda b, q: (b, q, 0))]
    if return_wei:
        out_shapes.append(jax.ShapeDtypeStruct((B, T, T), wei_dtype))
        out_specs.append(pl.BlockSpec((block_b, q_block, T),
                                      lambda b, q: (b, q, 0)))

    grid_spec = pltpu.PrefetchScalarGridSpec(
        num_scalar_prefetch=0,
        grid=(n_b, n_q),
        in_specs=[
            pl.BlockSpec((block_b, T, C), lambda b, q: (b, 0, 0)),   # x
            pl.BlockSpec((T, C), lambda b, q: (0, 0)),               # pos (resident)
            pl.BlockSpec((C, H), lambda b, q: (0, 0)),               # Wk (resident)
            pl.BlockSpec((C, H), lambda b, q: (0, 0)),               # Wq (resident)
            pl.BlockSpec((C, H), lambda b, q: (0, 0)),               # Wv (resident)
        ],
        out_specs=tuple(out_specs),
        scratch_shapes=[
            pltpu.VMEM((block_b, T, H), compute_dtype),              # K cache
            pltpu.VMEM((block_b, T, H), compute_dtype),              # V cache
        ],
    )

    results = pl.pallas_call(
        kernel,
        out_shape=tuple(out_shapes),
        grid_spec=grid_spec,
        compiler_params=pltpu.CompilerParams(
            dimension_semantics=("parallel", "arbitrary"),
            vmem_limit_bytes=vmem_limit),
    )(xk, pos, wk_c, wq_c, wv_c)

    if return_wei:
        out, wei = results
        return out, wei
    return results[0]


# --------------------------------------------------------------------------- #
# Pure-JAX reference (matches the PyTorch forward in eval mode)
# --------------------------------------------------------------------------- #
def reference_forward(x, pos_emb, wk, wq, wv):
    H = wk.shape[1]
    xp = x + pos_emb
    k = xp @ wk
    q = xp @ wq
    v = x @ wv
    wei = (q @ jnp.swapaxes(k, -2, -1)) * (H ** -0.5)
    T = x.shape[1]
    tril = jnp.tril(jnp.ones((T, T), dtype=bool))
    wei = jnp.where(tril, wei, -jnp.inf)
    wei = jax.nn.softmax(wei, axis=-1)
    out = wei @ v
    return out, wei


if __name__ == "__main__":
    # Shapes consistent with the module:
    #   batch B=2, seq T=block_size=8, n_embd C=32, head_size H=16, dropout=0.0
    B, T, C, H = 2, 8, 32, 16

    key = jax.random.PRNGKey(0)
    kx, kp, kk, kq, kv = jax.random.split(key, 5)

    x = jax.random.normal(kx, (B, T, C), dtype=jnp.float32)
    pos_emb = jax.random.normal(kp, (T, C), dtype=jnp.float32)

    # Deterministic "Linear(bias=False)" weights, stored pre-transposed (C, H).
    wk = jax.random.normal(kk, (C, H), dtype=jnp.float32) * (C ** -0.5)
    wq = jax.random.normal(kq, (C, H), dtype=jnp.float32) * (C ** -0.5)
    wv = jax.random.normal(kv, (C, H), dtype=jnp.float32) * (C ** -0.5)

    ref_out, ref_wei = reference_forward(x, pos_emb, wk, wq, wv)

    # ---- exact-precision path (f32 MXU inputs); approx reciprocal only ------
    out, wei = head_forward(x, pos_emb, wk, wq, wv, compute_dtype=jnp.float32)
    out = jax.block_until_ready(out)
    wei = jax.block_until_ready(wei)
    assert jnp.allclose(out, ref_out, atol=2e-3, rtol=2e-3), "out mismatch (f32)"
    assert jnp.allclose(wei, ref_wei, atol=2e-3, rtol=2e-3), "wei mismatch (f32)"

    # ---- default bf16 MXU path (looser tolerance is expected precision loss)
    out_bf, wei_bf = head_forward(x, pos_emb, wk, wq, wv)
    out_bf = jax.block_until_ready(out_bf)
    wei_bf = jax.block_until_ready(wei_bf)
    assert jnp.allclose(out_bf, ref_out, atol=5e-2, rtol=5e-2), "out mismatch (bf16)"
    assert jnp.allclose(wei_bf, ref_wei, atol=5e-2, rtol=5e-2), "wei mismatch (bf16)"

    # ---- wei-free path (drops the O(T^2) writeback entirely) ----------------
    out_only = head_forward(x, pos_emb, wk, wq, wv, compute_dtype=jnp.float32,
                            return_wei=False)
    out_only = jax.block_until_ready(out_only)
    assert jnp.allclose(out_only, ref_out, atol=2e-3, rtol=2e-3), "out-only mismatch"

    print("KERNEL_OK")
</pallas_src>

<mosaic_0001>
module attributes {stable_mosaic.version = 11 : i64} {
  func.func @_head_kernel(%arg0: i32, %arg1: i32, %arg2: memref<2x8x32xf32, #tpu.memory_space<vmem>>, %arg3: memref<8x32xf32, #tpu.memory_space<vmem>>, %arg4: memref<32x16xf32, #tpu.memory_space<vmem>>, %arg5: memref<32x16xf32, #tpu.memory_space<vmem>>, %arg6: memref<32x16xf32, #tpu.memory_space<vmem>>, %arg7: memref<2x8x16xf32, #tpu.memory_space<vmem>>, %arg8: memref<2x8x8xf32, #tpu.memory_space<vmem>>, %arg9: memref<2x8x16xf32, #tpu.memory_space<vmem>>, %arg10: memref<2x8x16xf32, #tpu.memory_space<vmem>>) attributes {dimension_semantics = [#tpu.dimension_semantics<parallel>, #tpu.dimension_semantics<arbitrary>], iteration_bounds = array<i64: 1, 1>, scalar_prefetch = 0 : i64, scratch_operands = 2 : i64, tpu.core_type = #tpu.core_type<tc>, window_params = [{transform_indices = @transform_0, window_bounds = array<i64: 2, 8, 32>}, {pipeline_mode = #tpu.pipeline_mode<synchronous>, transform_indices = @transform_1, window_bounds = array<i64: 8, 32>}, {pipeline_mode = #tpu.pipeline_mode<synchronous>, transform_indices = @transform_2, window_bounds = array<i64: 32, 16>}, {pipeline_mode = #tpu.pipeline_mode<synchronous>, transform_indices = @transform_3, window_bounds = array<i64: 32, 16>}, {pipeline_mode = #tpu.pipeline_mode<synchronous>, transform_indices = @transform_4, window_bounds = array<i64: 32, 16>}, {transform_indices = @transform_5, window_bounds = array<i64: 2, 8, 16>}, {transform_indices = @transform_6, window_bounds = array<i64: 2, 8, 8>}]} {
    %c0_i32 = arith.constant 0 : i32
    %0 = arith.cmpi eq, %arg1, %c0_i32 : i32
    %1 = arith.extui %0 : i1 to i32
    %c0_i32_0 = arith.constant 0 : i32
    %2 = arith.cmpi ne, %1, %c0_i32_0 : i32
    scf.if %2 {
      %c0_23 = arith.constant 0 : index
      %c0_24 = arith.constant 0 : index
      %c0_25 = arith.constant 0 : index
      %44 = vector.load %arg2[%c0_23, %c0_24, %c0_25] : memref<2x8x32xf32, #tpu.memory_space<vmem>>, vector<2x8x32xf32>
      %c0_26 = arith.constant 0 : index
      %c0_27 = arith.constant 0 : index
      %45 = vector.load %arg3[%c0_26, %c0_27] : memref<8x32xf32, #tpu.memory_space<vmem>>, vector<8x32xf32>
      %46 = vector.shape_cast %45 : vector<8x32xf32> to vector<1x8x32xf32>
      %47 = vector.broadcast %46 : vector<1x8x32xf32> to vector<2x8x32xf32>
      %48 = arith.addf %44, %47 : vector<2x8x32xf32>
      %49 = vector.shape_cast %48 : vector<2x8x32xf32> to vector<16x32xf32>
      %c0_28 = arith.constant 0 : index
      %c0_29 = arith.constant 0 : index
      %50 = vector.load %arg4[%c0_28, %c0_29] : memref<32x16xf32, #tpu.memory_space<vmem>>, vector<32x16xf32>
      %cst_30 = arith.constant dense<0.000000e+00> : vector<16x16xf32>
      %51 = tpu.matmul %49, %50, %cst_30 {dimension_numbers = #tpu.dot_dimension_numbers<[1], [0], [0], [1], [0, 0, 1, 1], [], []>} : vector<16x32xf32>, vector<32x16xf32>, vector<16x16xf32> -> vector<16x16xf32>
      %52 = vector.shape_cast %44 : vector<2x8x32xf32> to vector<16x32xf32>
      %c0_31 = arith.constant 0 : index
      %c0_32 = arith.constant 0 : index
      %53 = vector.load %arg6[%c0_31, %c0_32] : memref<32x16xf32, #tpu.memory_space<vmem>>, vector<32x16xf32>
      %cst_33 = arith.constant dense<0.000000e+00> : vector<16x16xf32>
      %54 = tpu.matmul %52, %53, %cst_33 {dimension_numbers = #tpu.dot_dimension_numbers<[1], [0], [0], [1], [0, 0, 1, 1], [], []>} : vector<16x32xf32>, vector<32x16xf32>, vector<16x16xf32> -> vector<16x16xf32>
      %55 = vector.shape_cast %51 : vector<16x16xf32> to vector<2x8x16xf32>
      %c0_34 = arith.constant 0 : index
      %c0_35 = arith.constant 0 : index
      %c0_36 = arith.constant 0 : index
      %56 = vector.load %arg9[%c0_34, %c0_35, %c0_36] : memref<2x8x16xf32, #tpu.memory_space<vmem>>, vector<2x8x16xf32>
      tpu.vector_store %arg9[%c0_34, %c0_35, %c0_36], %55 {strides = array<i32>} : memref<2x8x16xf32, #tpu.memory_space<vmem>>, vector<2x8x16xf32>,
      %57 = vector.shape_cast %54 : vector<16x16xf32> to vector<2x8x16xf32>
      %c0_37 = arith.constant 0 : index
      %c0_38 = arith.constant 0 : index
      %c0_39 = arith.constant 0 : index
      %58 = vector.load %arg10[%c0_37, %c0_38, %c0_39] : memref<2x8x16xf32, #tpu.memory_space<vmem>>, vector<2x8x16xf32>
      tpu.vector_store %arg10[%c0_37, %c0_38, %c0_39], %57 {strides = array<i32>} : memref<2x8x16xf32, #tpu.memory_space<vmem>>, vector<2x8x16xf32>,
    } else {
    }
    %c8_i32 = arith.constant 8 : i32
    %3 = arith.muli %arg1, %c8_i32 : i32
    %4 = tpu.assume_multiple %3, 8 : i32
    %c0 = arith.constant 0 : index
    %5 = arith.index_cast %4 : i32 to index
    %c0_1 = arith.constant 0 : index
    %6 = vector.load %arg2[%c0, %5, %c0_1] : memref<2x8x32xf32, #tpu.memory_space<vmem>>, vector<2x8x32xf32>
    %7 = arith.index_cast %4 : i32 to index
    %c0_2 = arith.constant 0 : index
    %8 = vector.load %arg3[%7, %c0_2] : memref<8x32xf32, #tpu.memory_space<vmem>>, vector<8x32xf32>
    %9 = vector.shape_cast %8 : vector<8x32xf32> to vector<1x8x32xf32>
    %10 = vector.broadcast %9 : vector<1x8x32xf32> to vector<2x8x32xf32>
    %11 = arith.addf %6, %10 : vector<2x8x32xf32>
    %12 = vector.shape_cast %11 : vector<2x8x32xf32> to vector<16x32xf32>
    %c0_3 = arith.constant 0 : index
    %c0_4 = arith.constant 0 : index
    %13 = vector.load %arg5[%c0_3, %c0_4] : memref<32x16xf32, #tpu.memory_space<vmem>>, vector<32x16xf32>
    %cst = arith.constant dense<0.000000e+00> : vector<16x16xf32>
    %14 = tpu.matmul %12, %13, %cst {dimension_numbers = #tpu.dot_dimension_numbers<[1], [0], [0], [1], [0, 0, 1, 1], [], []>} : vector<16x32xf32>, vector<32x16xf32>, vector<16x16xf32> -> vector<16x16xf32>
    %15 = vector.shape_cast %14 : vector<16x16xf32> to vector<2x8x16xf32>
    %c0_5 = arith.constant 0 : index
    %c0_6 = arith.constant 0 : index
    %c0_7 = arith.constant 0 : index
    %16 = vector.load %arg9[%c0_5, %c0_6, %c0_7] : memref<2x8x16xf32, #tpu.memory_space<vmem>>, vector<2x8x16xf32>
    %cst_8 = arith.constant dense<0.000000e+00> : vector<2x8x8xf32>
    %17 = tpu.matmul %15, %16, %cst_8 {dimension_numbers = #tpu.dot_dimension_numbers<[2], [2], [1], [1], [0, 0, 0, 1, 1, 1], [0], [0]>} : vector<2x8x16xf32>, vector<2x8x16xf32>, vector<2x8x8xf32> -> vector<2x8x8xf32>
    %cst_9 = arith.constant 2.500000e-01 : f32
    %18 = vector.broadcast %cst_9 : f32 to vector<2x8x8xf32>
    %19 = arith.mulf %17, %18 : vector<2x8x8xf32>
    %20 = tpu.iota {dimensions = array<i32: 0>} : vector<8x8xi32>
    %21 = vector.broadcast %4 : i32 to vector<8x8xi32>
    %22 = arith.addi %21, %20 : vector<8x8xi32>
    %23 = tpu.iota {dimensions = array<i32: 1>} : vector<8x8xi32>
    %24 = arith.cmpi sge, %22, %23 : vector<8x8xi32>
    %25 = vector.shape_cast %24 : vector<8x8xi1> to vector<1x8x8xi1>
    %cst_10 = arith.constant -1.000000e+30 : f32
    %26 = vector.shape_cast %25 : vector<1x8x8xi1> to vector<1x8x8xi1>
    %27 = vector.broadcast %26 : vector<1x8x8xi1> to vector<2x8x8xi1>
    %28 = vector.broadcast %cst_10 : f32 to vector<2x8x8xf32>
    %29 = arith.select %27, %19, %28 : vector<2x8x8xi1>, vector<2x8x8xf32>
    %cst_11 = arith.constant dense<0xFF800000> : vector<2x8xf32>
    %30 = vector.multi_reduction <maximumf>, %29, %cst_11 [2] : vector<2x8x8xf32> to vector<2x8xf32>
    %31 = vector.shape_cast %30 : vector<2x8xf32> to vector<2x8x1xf32>
    %32 = vector.broadcast %31 : vector<2x8x1xf32> to vector<2x8x8xf32>
    %33 = arith.subf %29, %32 : vector<2x8x8xf32>
    %34 = math.exp %33 : vector<2x8x8xf32>
    %cst_12 = arith.constant dense<0.000000e+00> : vector<2x8xf32>
    %35 = vector.multi_reduction <add>, %34, %cst_12 [2] : vector<2x8x8xf32> to vector<2x8xf32>
    %36 = vector.shape_cast %35 : vector<2x8xf32> to vector<2x8x1xf32>
    %37 = tpu.reciprocal %36 {approx = true} : vector<2x8x1xf32> -> vector<2x8x1xf32>
    %38 = vector.broadcast %37 : vector<2x8x1xf32> to vector<2x8x8xf32>
    %39 = arith.mulf %34, %38 : vector<2x8x8xf32>
    %c0_13 = arith.constant 0 : index
    %c0_14 = arith.constant 0 : index
    %c0_15 = arith.constant 0 : index
    %40 = vector.load %arg10[%c0_13, %c0_14, %c0_15] : memref<2x8x16xf32, #tpu.memory_space<vmem>>, vector<2x8x16xf32>
    %cst_16 = arith.constant dense<0.000000e+00> : vector<2x8x16xf32>
    %41 = tpu.matmul %39, %40, %cst_16 {dimension_numbers = #tpu.dot_dimension_numbers<[2], [1], [1], [2], [0, 0, 0, 1, 1, 2], [0], [0]>} : vector<2x8x8xf32>, vector<2x8x16xf32>, vector<2x8x16xf32> -> vector<2x8x16xf32>
    %c0_17 = arith.constant 0 : index
    %c0_18 = arith.constant 0 : index
    %c0_19 = arith.constant 0 : index
    %42 = vector.load %arg7[%c0_17, %c0_18, %c0_19] : memref<2x8x16xf32, #tpu.memory_space<vmem>>, vector<2x8x16xf32>
    tpu.vector_store %arg7[%c0_17, %c0_18, %c0_19], %41 {strides = array<i32>} : memref<2x8x16xf32, #tpu.memory_space<vmem>>, vector<2x8x16xf32>,
    %c0_20 = arith.constant 0 : index
    %c0_21 = arith.constant 0 : index
    %c0_22 = arith.constant 0 : index
    %43 = vector.load %arg8[%c0_20, %c0_21, %c0_22] : memref<2x8x8xf32, #tpu.memory_space<vmem>>, vector<2x8x8xf32>
    tpu.vector_store %arg8[%c0_20, %c0_21, %c0_22], %39 {strides = array<i32>} : memref<2x8x8xf32, #tpu.memory_space<vmem>>, vector<2x8x8xf32>,
    return
  }
  func.func @transform_0(%arg0: i32, %arg1: i32) -> (i32, i32, i32) {
    %c0_i32 = arith.constant 0 : i32
    %c0_i32_0 = arith.constant 0 : i32
    %c0_i32_1 = arith.constant 0 : i32
    return %arg0, %c0_i32, %c0_i32_0 : i32, i32, i32
  }
  func.func @transform_1(%arg0: i32, %arg1: i32) -> (i32, i32) {
    %c0_i32 = arith.constant 0 : i32
    %c0_i32_0 = arith.constant 0 : i32
    %c0_i32_1 = arith.constant 0 : i32
    return %c0_i32, %c0_i32_0 : i32, i32
  }
  func.func @transform_2(%arg0: i32, %arg1: i32) -> (i32, i32) {
    %c0_i32 = arith.constant 0 : i32
    %c0_i32_0 = arith.constant 0 : i32
    %c0_i32_1 = arith.constant 0 : i32
    return %c0_i32, %c0_i32_0 : i32, i32
  }
  func.func @transform_3(%arg0: i32, %arg1: i32) -> (i32, i32) {
    %c0_i32 = arith.constant 0 : i32
    %c0_i32_0 = arith.constant 0 : i32
    %c0_i32_1 = arith.constant 0 : i32
    return %c0_i32, %c0_i32_0 : i32, i32
  }
  func.func @transform_4(%arg0: i32, %arg1: i32) -> (i32, i32) {
    %c0_i32 = arith.constant 0 : i32
    %c0_i32_0 = arith.constant 0 : i32
    %c0_i32_1 = arith.constant 0 : i32
    return %c0_i32, %c0_i32_0 : i32, i32
  }
  func.func @transform_5(%arg0: i32, %arg1: i32) -> (i32, i32, i32) {
    %c0_i32 = arith.constant 0 : i32
    %c0_i32_0 = arith.constant 0 : i32
    return %arg0, %arg1, %c0_i32 : i32, i32, i32
  }
  func.func @transform_6(%arg0: i32, %arg1: i32) -> (i32, i32, i32) {
    %c0_i32 = arith.constant 0 : i32
    %c0_i32_0 = arith.constant 0 : i32
    return %arg0, %arg1, %c0_i32 : i32, i32, i32
  }
}

</mosaic_0001>

<bundles_post_ra>
// kernel: tpu_custom_call.1
= control target key start
LH: loop header
LB: loop body
LE: loop exit
PB: predicated region body
PF: predicated region fallthrough
CT: control target
= control target key end

     0   :  { %12 = vsyncpa [#allocation5], 0  ;;  %s1221_s0 = inlined_call_operand.hbm [shape: f32[2,8,32], index: 0, kind: input, shape index: {}]   ;;  %s1222_s1 = inlined_call_operand.hbm [shape: f32[8,32], index: 1, kind: input, shape index: {}]   ;;  %s1223_s2 = inlined_call_operand.hbm [shape: f32[32,16], index: 2, kind: input, shape index: {}]   ;;  %s1224_s3 = inlined_call_operand.hbm [shape: f32[32,16], index: 3, kind: input, shape index: {}]   ;;  %s1225_s4 = inlined_call_operand.hbm [shape: f32[32,16], index: 4, kind: input, shape index: {}]   ;;  %s1226_s5 = inlined_call_operand.hbm [shape: f32[2,8,16], index: 5, kind: output, shape index: {0}]   ;;  %s1227_s6 = inlined_call_operand.hbm [shape: f32[2,8,8], index: 6, kind: output, shape index: {1}]  }
   0x1   :  { %13 = vsyncpa [#allocation8], 0 }
   0x2   :  { %14 = vsyncpa [#allocation11], 0 }
   0x3   :  { %15 = vsyncpa [#allocation6], 0 }
   0x4   :  { %16 = vsyncpa [#allocation15], 0  ;;  %s1045_s21 = smov [#allocation7]   ;;  %s881_s25 = scalar_lea.hbm %s1222_s1, 128 }
   0x5   :  { %s35_s22 = sshll.u32 %s1045_s21, 4  ;;  %p882_p0 = scmp.ne.s32.totalorder %s1222_s1, %s881_s25  ;;  %s36_s22 = int_to_ptr.vmem [resolvable:$true] %s35_s22 }
   0x6   :  { %p885_p1 = scmp.lt.u32.totalorder %s881_s25, %s1222_s1 }
   0x8   :  { %p887_p2 = pnand %p885_p1, %p882_p0 }
   0xa   :  { %890 = shalt.err (!%p887_p2)
}
   0xb   :  { %s891_s30 = scalar_lea.vmem %s36_s22, 128  ;;  %p896_p4 = scmp.lt.s32.totalorder %s36_s22, %s36_s22 }
   0xc   :  { %p892_p3 = scmp.ne.s32.totalorder %s36_s22, %s891_s30  ;;  %p897_p5 = scmp.lt.s32.totalorder %s891_s30, %s891_s30 }
   0xe   :  { %p898_p6 = por %p897_p5, %p896_p4 }
  0x10   :  { %p899_p7 = pnand %p898_p6, %p892_p3 }
  0x12   :  { %902 = shalt.err (!%p899_p7)
}
  0x13   :  { %38 = dma.hbm_to_vmem [thread:$0]  %s1222_s1, 128, %s36_s22, [#allocation8]  }
  0x14   :  { %s1046_s9 = smov [#allocation10]   ;;  %s1047_s11 = smov [#allocation4]  }
  0x15   :  { %s56_s10 = sshll.u32 %s1046_s9, 4  ;;  %s22_s12 = sshll.u32 %s1047_s11, 4  ;;  %s57_s10 = int_to_ptr.vmem [resolvable:$true] %s56_s10  ;;  %s23_s12 = int_to_ptr.vmem [resolvable:$true] %s22_s12 }
  0x16   :  { %s903_s15 = scalar_lea.hbm %s1224_s3, 512 }
  0x17   :  { %p904_p8 = scmp.ne.s32.totalorder %s1224_s3, %s903_s15  ;;  %p907_p9 = scmp.lt.u32.totalorder %s903_s15, %s1224_s3 }
  0x19   :  { %p909_p10 = pnand %p907_p9, %p904_p8 }
  0x1b   :  { %912 = shalt.err (!%p909_p10)
}
  0x1c   :  { %s913_s1 = scalar_lea.vmem %s57_s10, 512  ;;  %p918_p12 = scmp.lt.s32.totalorder %s57_s10, %s57_s10 }
  0x1d   :  { %p914_p11 = scmp.ne.s32.totalorder %s57_s10, %s913_s1  ;;  %p919_p13 = scmp.lt.s32.totalorder %s913_s1, %s913_s1 }
  0x1f   :  { %p920_p0 = por %p919_p13, %p918_p12 }
  0x21   :  { %p921_p1 = pnand %p920_p0, %p914_p11 }
  0x23   :  { %924 = shalt.err (!%p921_p1)
}
  0x24   :  { %s1048_s20 = smov 128   ;;  %s1049_s21 = smov 8  }
  0x25   :  { %62 = dma.hbm_to_vmem [thread:$0]  %s1224_s3, 512, %s57_s10, [#allocation11], %s1048_s20, %s1048_s20, %s1049_s21  }
  0x26   :  { %s925_s26 = scalar_lea.hbm %s1221_s0, 256 }
  0x27   :  { %p926_p2 = scmp.ne.s32.totalorder %s1221_s0, %s925_s26  ;;  %p929_p3 = scmp.lt.u32.totalorder %s925_s26, %s1221_s0 }
  0x29   :  { %p931_p4 = pnand %p929_p3, %p926_p2 }
  0x2b   :  { %934 = shalt.err (!%p931_p4)
}
  0x2c   :  { %s935_s7 = scalar_lea.vmem %s23_s12, 256  ;;  %p940_p6 = scmp.lt.s32.totalorder %s23_s12, %s23_s12 }
  0x2d   :  { %p936_p5 = scmp.ne.s32.totalorder %s23_s12, %s935_s7  ;;  %p941_p7 = scmp.lt.s32.totalorder %s935_s7, %s935_s7 }
  0x2f   :  { %p942_p8 = por %p941_p7, %p940_p6 }
  0x31   :  { %p943_p9 = pnand %p942_p8, %p936_p5 }
  0x33   :  { %946 = shalt.err (!%p943_p9)
}
  0x34   :  { %28 = dma.hbm_to_vmem [thread:$0]  %s1221_s0, 256, %s23_s12, [#allocation5], %s1048_s20, %s1048_s20, %s1049_s21  }
  0x35   :  { %s1050_s9 = smov [#allocation9]   ;;  %s1051_s11 = smov [#allocation12]  }
  0x36   :  { %s44_s10 = sshll.u32 %s1050_s9, 4  ;;  %s68_s13 = sshll.u32 %s1051_s11, 4  ;;  %s45_s10 = int_to_ptr.vmem [resolvable:$true] %s44_s10  ;;  %s69_s13 = int_to_ptr.vmem [resolvable:$true] %s68_s13 }
  0x37   :  { %s947_s16 = scalar_lea.hbm %s1223_s2, 512 }
  0x38   :  { %p948_p10 = scmp.ne.s32.totalorder %s1223_s2, %s947_s16  ;;  %p951_p11 = scmp.lt.u32.totalorder %s947_s16, %s1223_s2 }
  0x3a   :  { %p953_p12 = pnand %p951_p11, %p948_p10 }
  0x3c   :  { %956 = shalt.err (!%p953_p12)
}
  0x3d   :  { %s957_s0 = scalar_lea.vmem %s45_s10, 512  ;;  %p962_p0 = scmp.lt.s32.totalorder %s45_s10, %s45_s10 }
  0x3e   :  { %p958_p13 = scmp.ne.s32.totalorder %s45_s10, %s957_s0  ;;  %p963_p1 = scmp.lt.s32.totalorder %s957_s0, %s957_s0 }
  0x40   :  { %p964_p2 = por %p963_p1, %p962_p0 }
  0x42   :  { %p965_p3 = pnand %p964_p2, %p958_p13 }
  0x44   :  { %968 = shalt.err (!%p965_p3)
}
  0x45   :  { %50 = dma.hbm_to_vmem [thread:$0]  %s1223_s2, 512, %s45_s10, [#allocation8], %s1048_s20, %s1048_s20, %s1049_s21  }
  0x46   :  { %s969_s25 = scalar_lea.hbm %s1225_s4, 512 }
  0x47   :  { %p970_p4 = scmp.ne.s32.totalorder %s1225_s4, %s969_s25  ;;  %p973_p5 = scmp.lt.u32.totalorder %s969_s25, %s1225_s4 }
  0x49   :  { %p975_p6 = pnand %p973_p5, %p970_p4 }
  0x4b   :  { %978 = shalt.err (!%p975_p6)
}
  0x4c   :  { %s979_s30 = scalar_lea.vmem %s69_s13, 512  ;;  %p984_p8 = scmp.lt.s32.totalorder %s69_s13, %s69_s13 }
  0x4d   :  { %p980_p7 = scmp.ne.s32.totalorder %s69_s13, %s979_s30  ;;  %p985_p9 = scmp.lt.s32.totalorder %s979_s30, %s979_s30 }
  0x4f   :  { %p986_p10 = por %p985_p9, %p984_p8 }
  0x51   :  { %p987_p11 = pnand %p986_p10, %p980_p7 }
  0x53   :  { %990 = shalt.err (!%p987_p11)
}
  0x54   :  { %74 = dma.hbm_to_vmem [thread:$0]  %s1225_s4, 512, %s69_s13, [#allocation11], %s1048_s20, %s1048_s20, %s1049_s21  }
  0x55   :  { %1035 = dma.done.wait [#allocation5], 256  }
  0x56   :  { %1036 = vsyncadd [#allocation5], 4294967040 }
  0x57   :  { %1037 = dma.done.wait [#allocation8], 640  }
  0x58   :  { %1038 = vsyncadd [#allocation8], 4294966656 }
  0x59   :  { %1039 = dma.done.wait [#allocation11], 1024  }
  0x5a   :  { %1040 = vsyncadd [#allocation11], 4294966272  ;;  %v99_v0 = vld [vmem:[#allocation9] sm:$0xff]  ;;  %v100_v1 = vld [vmem:[#allocation9 + $0x8] sm:$0xff]  ;;  %vm103_vm0 = vcmask 261120   ;;  %v1052_v23 = vmov 0.0   ;;  %v526_v34 = vlaneseq }
  0x5b   :  { %v101_v2 = vld [vmem:[#allocation9 + $0x10] sm:$0xff]  ;;  %v838_v3 = vpack.c.bf16 %v100_v1, %v99_v0  ;;  %v102_v4 = vld [vmem:[#allocation9 + $0x18] sm:$0xff]  ;;  %v94_v5 = vld [vmem:[#allocation4] sm:$0xff]  ;;  %vm1053_vm1 = vmmov 0   ;;  %vm270_vm2 = vcmask 130048   ;;  %vm537_vm4 = vcmask 64512  }
  0x5c   :  { %v842_v6 = vpack.c.bf16 %v102_v4, %v101_v2  ;;  %v96_v7 = vld [vmem:[#allocation7] sm:$0xff]  ;;  %v283_v8 = vld [vmem:[#allocation10] sm:$0xff]  ;;  %v284_v9 = vld [vmem:[#allocation10 + $0x8] sm:$0xff]  ;;  %804 = vmatprep.mubr.msk.f32.mxu1 %vm103_vm0, %v94_v5  ;;  %v527_v35 = vshrl.u32 %v526_v34, 7  ;;  %v531_v36 = vand.u32 127, %v526_v34  ;;  %s1054_s4 = smov [#allocation14]  }
  0x5d   :  { %839 = vmatprep.subr.bf16.mxu0 %v838_v3  ;;  %v97_v10 = vadd.f32 %v96_v7, %v94_v5  ;;  %v185_v11 = vld [vmem:[#allocation12] sm:$0xff]  ;;  %v95_v12 = vld [vmem:[#allocation4 + $0x8] sm:$0xff]  ;;  %v186_v13 = vld [vmem:[#allocation12 + $0x8] sm:$0xff]  ;;  %v854_v14 = vpack.c.bf16 %v284_v9, %v283_v8  ;;  %s729_s3 = sshll.u32 %s1054_s4, 4  ;;  %s730_s3 = int_to_ptr.vmem [resolvable:$true] %s729_s3 }
  0x5e   :  { %841 = vmatpush3.bf16.msra.mxu0 %v838_v3  ;;  %v846_v15 = vpack.c.bf16 %v186_v13, %v185_v11  ;;  %v285_v16 = vld [vmem:[#allocation10 + $0x10] sm:$0xff]  ;;  %v286_v17 = vld [vmem:[#allocation10 + $0x18] sm:$0xff]  ;;  %v98_v18 = vadd.f32 %v96_v7, %v95_v12  ;;  %vm532_vm3 = vcmp.ge.s32.totalorder %v527_v35, %v531_v36  ;;  %s991_s8 = scalar_lea.vmem %s730_s3, 256  ;;  %p996_p13 = scmp.lt.s32.totalorder %s730_s3, %s730_s3 }
  0x5f   :  { %843 = vmatprep.subr.bf16.mxu0 %v842_v6  ;;  %793 = vmatprep.mubr.msk.f32.mxu0 %vm103_vm0, %v97_v10  ;;  %v858_v19 = vpack.c.bf16 %v286_v17, %v285_v16  ;;  %v187_v20 = vld [vmem:[#allocation12 + $0x10] sm:$0xff]  ;;  %v188_v21 = vld [vmem:[#allocation12 + $0x18] sm:$0xff]  ;;  %p992_p12 = scmp.ne.s32.totalorder %s730_s3, %s991_s8  ;;  %p997_p0 = scmp.lt.s32.totalorder %s991_s8, %s991_s8 }
  0x60   :  { %847 = vmatprep.subr.bf16.mxu1 %v846_v15  ;;  %v850_v22 = vpack.c.bf16 %v188_v21, %v187_v20 }
  0x61   :  { %849 = vmatpush3.bf16.msra.mxu1 %v846_v15  ;;  %p998_p1 = por %p997_p0, %p996_p13 }
  0x62   :  { %845 = vmatpush3.bf16.msra.mxu0 %v842_v6  ;;  %851 = vmatprep.subr.bf16.mxu1 %v850_v22 }
  0x63   :  { %855 = vmatprep.subr.bf16.mxu0 %v854_v14  ;;  %p999_p2 = pnand %p998_p1, %p992_p12 }
  0x65   :  { %794 = vmatmul.mubr.msk.f32.vlgmr.msra.gmra.mrb[0].mxu0 %vm103_vm0, %v98_v18  ;;  %853 = vmatpush3.bf16.msra.mxu1 %v850_v22 }
  0x66   :  { %857 = vmatpush3.bf16.msra.mxu0 %v854_v14  ;;  %815 = vmatprep.mubr.msk.f32.mxu0 %vm103_vm0, %v97_v10 }
  0x67   :  { %859 = vmatprep.subr.bf16.mxu0 %v858_v19  ;;  %818 = vmatprep.subr.mxu1 %v1052_v23 }
  0x68   :  { %805 = vmatmul.mubr.msk.f32.vlgmr.msra.gmra.mrb[0].mxu1 %vm103_vm0, %v95_v12 }
  0x69   :  { %820 = vmatprep.mubr.msk.f32.mxu1 %vm1053_vm1, %v1052_v23 }
  0x6a   :  { %861 = vmatpush3.bf16.msra.mxu0 %v858_v19 }
  0x6b   :  { %828 = vmatprep.subr.mxu0 %v1052_v23 }
  0x6d   :  { %816 = vmatmul.mubr.msk.f32.vlgmr.msra.gmra.mrb[2].mxu0 %vm103_vm0, %v98_v18 }
  0x6e   :  { %830 = vmatprep.mubr.msk.f32.mxu0 %vm1053_vm1, %v1052_v23 }
 0x138   :  { %v795_v24 = vpop.f32.mrb[0].mxu0 }
 0x139   :  { %272 = vst.msk [vmem:[#allocation2 + $0x8] sm:$0xff] %vm270_vm2, %v795_v24  ;;  %v176_v25 = vpop.f32.mrb[1].mxu0 }
 0x13a   :  { %271 = vst.msk [vmem:[#allocation2] sm:$0xff] %vm270_vm2, %v176_v25 }
 0x13b   :  { %v806_v30 = vpop.f32.mrb[0].mxu1 }
 0x13c   :  { %274 = vst.msk [vmem:[#allocation3 + $0x8] sm:$0xff] %vm270_vm2, %v806_v30  ;;  %v261_v31 = vpop.f32.mrb[1].mxu1 }
 0x13d   :  { %273 = vst.msk [vmem:[#allocation3] sm:$0xff] %vm270_vm2, %v261_v31 }
 0x140   :  { %v817_v26 = vpop.f32.mrb[2].mxu0  ;;  %v370_v29 = vld [vmem:[#allocation2 + $0x8] sm:$0xff] }
 0x141   :  { %v369_v27 = vld [vmem:[#allocation2] sm:$0xff]  ;;  %v360_v28 = vpop.f32.mrb[3].mxu0 }
 0x142   :  { %819 = vmatpush3.xpose.msk.msra.mxu1 %vm270_vm2, %v369_v27 }
 0x143   :  { %823 = vmatprep.subr.mxu1 %v1052_v23  ;;  %v561_v33 = vld [vmem:[#allocation3 + $0x8] sm:$0xff] }
 0x144   :  { %v560_v32 = vld [vmem:[#allocation3] sm:$0xff] }
 0x145   :  { %821 = vmatmul.mubr.msk.f32.vlgmr.msra.gmra.mrb[2].mxu1 %vm270_vm2, %v360_v28  ;;  %829 = vmatpush3.msra.mxu0 %v560_v32 }
 0x146   :  { %824 = vmatpush3.xpose.msk.msra.mxu1 %vm270_vm2, %v370_v29  ;;  %825 = vmatprep.mubr.msk.f32.mxu1 %vm1053_vm1, %v1052_v23 }
 0x147   :  { %833 = vmatprep.subr.mxu1 %v1052_v23 }
 0x149   :  { %826 = vmatmul.mubr.msk.f32.vlgmr.msra.gmra.mrb[4].mxu1 %vm270_vm2, %v817_v26 }
 0x14a   :  { %835 = vmatprep.mubr.msk.f32.mxu1 %vm1053_vm1, %v1052_v23  ;;  %834 = vmatpush3.msra.mxu1 %v561_v33 }
 0x218   :  { %v444_v37 = vpop.f32.mrb[2].mxu1 }
 0x219   :  { %v524_v38 = vmul.f32 0.25, %v444_v37  ;;  %v822_v39 = vpop.f32.mrb[3].mxu1 }
 0x21b   :  { %v535_v40 = vsel %vm532_vm3, %v524_v38, -1e+30 }
 0x21c   :  { %v520_v41 = vpop.f32.mrb[4].mxu1  ;;  %v538_v42 = vsel %vm537_vm4, %v535_v40, -inf }
 0x21d   :  { %v525_v43 = vmul.f32 0.25, %v520_v41  ;;  %539 = vmax.xlane.f32.xlu0 %v538_v42  ;;  %v827_v44 = vpop.f32.mrb[5].mxu1 }
 0x21f   :  { %v536_v45 = vsel %vm532_vm3, %v525_v43, -1e+30 }
 0x220   :  { %v541_v46 = vsel %vm537_vm4, %v536_v45, -inf }
 0x221   :  { %542 = vmax.xlane.f32.xlu0 %v541_v46 }
 0x2aa   :  { %v540_v47 = vpop.xlane.xlu0 %539 }
 0x2ab   :  { %v544_v48 = vsub.f32 %v535_v40, %v540_v47 }
 0x2ad   :  { %v546_v49 = vmul.f32 1.442695, %v544_v48 }
 0x2ae   :  { %v543_v50 = vpop.xlane.xlu0 %542 }
 0x2af   :  { %873 = vpow2.f32 %v546_v49  ;;  %v545_v51 = vsub.f32 %v536_v45, %v543_v50 }
 0x2b1   :  { %v548_v52 = vmul.f32 1.442695, %v545_v51 }
 0x2b3   :  { %875 = vpow2.f32 %v548_v52 }
 0x2b9   :  { %v874_v53 = vpop.eup %873 }
 0x2ba   :  { %v550_v54 = vsel %vm537_vm4, %v874_v53, 0.0 }
 0x2bb   :  { %551 = vadd.xlane.f32.xlu1 %v550_v54 }
 0x2bd   :  { %v876_v55 = vpop.eup %875 }
 0x2be   :  { %v553_v56 = vsel %vm537_vm4, %v876_v55, 0.0 }
 0x2bf   :  { %554 = vadd.xlane.f32.xlu1 %v553_v56 }
 0x348   :  { %v552_v57 = vpop.xlane.xlu1 %551 }
 0x349   :  { %877 = vrcp.f32 %v552_v57 }
 0x34c   :  { %v555_v58 = vpop.xlane.xlu1 %554 }
 0x34d   :  { %879 = vrcp.f32 %v555_v58 }
 0x353   :  { %v878_v59 = vpop.eup %877 }
 0x354   :  { %v558_v60 = vmul.f32 %v878_v59, %v874_v53 }
 0x356   :  { %710 = vst.msk [vmem:[#allocation14] sm:$0xff] %vm537_vm4, %v558_v60  ;;  %831 = vmatmul.mubr.msk.f32.vlgmr.msra.gmra.mrb[4].mxu0 %vm537_vm4, %v558_v60 }
 0x357   :  { %v880_v61 = vpop.eup %879 }
 0x358   :  { %v559_v62 = vmul.f32 %v880_v61, %v876_v55 }
 0x35a   :  { %711 = vst.msk [vmem:[#allocation14 + $0x8] sm:$0xff] %vm537_vm4, %v559_v62  ;;  %836 = vmatmul.mubr.msk.f32.vlgmr.msra.gmra.mrb[6].mxu1 %vm537_vm4, %v559_v62 }
 0x35b   :  { %1002 = shalt.err (!%p999_p2)
}
 0x35c   :  { %s1003_s11 = scalar_lea.hbm %s1227_s6, 256 }
 0x35d   :  { %p1004_p3 = scmp.ne.s32.totalorder %s1227_s6, %s1003_s11  ;;  %p1007_p4 = scmp.lt.u32.totalorder %s1003_s11, %s1227_s6 }
 0x35f   :  { %p1009_p5 = pnand %p1007_p4, %p1004_p3 }
 0x361   :  { %1012 = shalt.err (!%p1009_p5)
}
 0x362   :  { %735 = dma.vmem_to_hbm [thread:$0]  %s730_s3, 256, %s1227_s6, [#allocation15], %s1048_s20, %s1048_s20, %s1049_s21  }
 0x363   :  { %s1055_s19 = smov [#allocation13]  }
 0x364   :  { %s717_s1 = sshll.u32 %s1055_s19, 4  ;;  %s718_s1 = int_to_ptr.vmem [resolvable:$true] %s717_s1 }
 0x365   :  { %s1013_s0 = scalar_lea.vmem %s718_s1, 256  ;;  %p1018_p7 = scmp.lt.s32.totalorder %s718_s1, %s718_s1 }
 0x366   :  { %p1014_p6 = scmp.ne.s32.totalorder %s718_s1, %s1013_s0  ;;  %p1019_p8 = scmp.lt.s32.totalorder %s1013_s0, %s1013_s0 }
 0x368   :  { %p1020_p9 = por %p1019_p8, %p1018_p7 }
 0x36a   :  { %p1021_p10 = pnand %p1020_p9, %p1014_p6 }
 0x429   :  { %v631_v63 = vpop.f32.mrb[4].mxu0 }
 0x42a   :  { %708 = vst.msk [vmem:[#allocation13] sm:$0xff] %vm270_vm2, %v631_v63  ;;  %v832_v0 = vpop.f32.mrb[5].mxu0 }
 0x42d   :  { %v704_v1 = vpop.f32.mrb[6].mxu1 }
 0x42e   :  { %709 = vst.msk [vmem:[#allocation13 + $0x8] sm:$0xff] %vm270_vm2, %v704_v1  ;;  %v837_v2 = vpop.f32.mrb[7].mxu1 }
 0x42f   :  { %1024 = shalt.err (!%p1021_p10)
}
 0x430   :  { %s1025_s22 = scalar_lea.hbm %s1226_s5, 256 }
 0x431   :  { %p1026_p11 = scmp.ne.s32.totalorder %s1226_s5, %s1025_s22  ;;  %p1029_p12 = scmp.lt.u32.totalorder %s1025_s22, %s1226_s5 }
 0x433   :  { %p1031_p13 = pnand %p1029_p12, %p1026_p11 }
 0x435   :  { %1034 = shalt.err (!%p1031_p13)
}
 0x436   :  { %723 = dma.vmem_to_hbm [thread:$0]  %s718_s1, 256, %s1226_s5, [#allocation6], %s1048_s20, %s1048_s20, %s1049_s21  }
 0x437   :  { %1041 = dma.done.wait [#allocation6], 256  }
 0x438   :  { %1042 = vsyncadd [#allocation6], 4294967040 }
 0x439   :  { %1043 = dma.done.wait [#allocation15], 256  }
 0x43a   :  { %1044 = vsyncadd [#allocation15], 4294967040 }
 0x43b   :  { %742 = vsyncpa [#allocation5], 1 }
 0x43c   :  { %743 = vsyncpa [#allocation8], 1 }
 0x43d   :  { %744 = vsyncpa [#allocation11], 1 }
 0x43e   :  { %745 = vsyncpa [#allocation6], 1 }
 0x43f   :  { %746 = vsyncpa [#allocation15], 1 }

</bundles_post_ra>
